<compile_context>
chip_gen: v7x
topology: tpu7x:2x2x1
jax: 0.10.0
libtpu: 0.0.40
codegen_flags: <defaults>
</compile_context>

<pallas_src>
import functools

import jax
import jax.numpy as jnp
from jax.experimental import pallas as pl
from jax.experimental.pallas import tpu as pltpu

EPS = 1e-8


def _round_up(x, m):
    return ((x + m - 1) // m) * m


@functools.lru_cache(maxsize=1)
def _vmem_capacity_bytes():
    """Per-core VMEM capacity: 128 MiB on v5e/v6e, 64 MiB on v7x."""
    try:
        cap = getattr(pltpu.get_tpu_info(), "vmem_capacity_bytes", None)
        if cap:
            return int(cap)
    except Exception:
        pass
    return 64 << 20  # conservative fallback (v7x-sized)


def _clamp_vmem(est, vmin, vmax):
    return int(min(max(est + (8 << 20), vmin), vmax))


def _sum_all_2d(x):
    """(rows, cols) f32 -> (1, 1): VPU adds across sublane rows, then one lane reduce."""
    return jnp.sum(jnp.sum(x, axis=0, keepdims=True), axis=1, keepdims=True)


# ----------------------------- single-pass kernel -----------------------------
# One whole (N, K) batch slab per grid step, resident in VMEM (one HBM read + one
# HBM write).  All f32 temporaries are bounded by row-chunking over the channel
# (sublane) axis, which only uses dynamic slices on the second-minor dimension.

def _gln_single_kernel(y_ref, gamma_ref, beta_ref, o_ref, *, inv_count, rchunk, sub):
    n_rows = y_ref.shape[0]
    n_full = n_rows // rchunk
    rem = n_rows - n_full * rchunk

    # ---- pass A (VMEM-resident): global sum -> mean ----
    def _sum_body(i, acc):
        r = pl.multiple_of(i * rchunk, sub)
        x = y_ref[pl.ds(r, rchunk), :].astype(jnp.float32)
        return acc + _sum_all_2d(x)

    s = jnp.zeros((1, 1), jnp.float32)
    if n_full > 0:
        s = jax.lax.fori_loop(0, n_full, _sum_body, s)
    if rem > 0:
        x = y_ref[pl.ds(n_full * rchunk, rem), :].astype(jnp.float32)
        s = s + _sum_all_2d(x)
    mean = s * inv_count

    # ---- pass B: centered sum of squares -> variance (matches (y - mean)^2) ----
    def _ss_body(i, acc):
        r = pl.multiple_of(i * rchunk, sub)
        d = y_ref[pl.ds(r, rchunk), :].astype(jnp.float32) - mean
        return acc + _sum_all_2d(d * d)

    ss = jnp.zeros((1, 1), jnp.float32)
    if n_full > 0:
        ss = jax.lax.fori_loop(0, n_full, _ss_body, ss)
    if rem > 0:
        d = y_ref[pl.ds(n_full * rchunk, rem), :].astype(jnp.float32) - mean
        ss = ss + _sum_all_2d(d * d)
    rstd = jax.lax.rsqrt(ss * inv_count + EPS)            # (1, 1)

    # ---- pass C: folded affine  out = y * (gamma*rstd) + (beta - mean*gamma*rstd) ----
    def _apply_rows(r, nr):
        g = gamma_ref[pl.ds(r, nr), :].astype(jnp.float32)   # (nr, 1)
        b = beta_ref[pl.ds(r, nr), :].astype(jnp.float32)
        scale = g * rstd
        bias = b - mean * scale
        x = y_ref[pl.ds(r, nr), :].astype(jnp.float32)
        o_ref[pl.ds(r, nr), :] = (x * scale + bias).astype(o_ref.dtype)

    def _apply_body(i, carry):
        _apply_rows(pl.multiple_of(i * rchunk, sub), rchunk)
        return carry

    if n_full > 0:
        jax.lax.fori_loop(0, n_full, _apply_body, 0)
    if rem > 0:
        _apply_rows(n_full * rchunk, rem)


# ----------------------------- two-pass kernels --------------------------------

def _gln_stats_kernel(y_ref, s_out, ss_out, s_acc, ss_acc, *, seq_len):
    # y_ref: (N, tk) one K tile of one batch slab.  s_out / ss_out: (1, 1) partial
    # sums per (batch, split).  Grid: (M, n_split, tiles_per_split).
    k = pl.program_id(2)

    @pl.when(k == 0)
    def _():
        s_acc[...] = jnp.zeros_like(s_acc)
        ss_acc[...] = jnp.zeros_like(ss_acc)

    x = y_ref[...].astype(jnp.float32)                      # (N, tk)
    tk = x.shape[1]
    if seq_len % tk != 0:
        # The globally last K tile reads past the end of the array; those lanes hold
        # unspecified data, so zero them before they touch the statistics.
        tile_idx = pl.program_id(1) * pl.num_programs(2) + k
        col = jax.lax.broadcasted_iota(jnp.int32, x.shape, 1) + tile_idx * tk
        x = jnp.where(col < seq_len, x, 0.0)

    s_acc[...] += jnp.sum(x, axis=0, keepdims=True)          # (1, tk)
    ss_acc[...] += jnp.sum(x * x, axis=0, keepdims=True)     # (1, tk)

    @pl.when(k == pl.num_programs(2) - 1)
    def _():
        s_out[...] = jnp.sum(s_acc[...], axis=1, keepdims=True)   # (1, 1)
        ss_out[...] = jnp.sum(ss_acc[...], axis=1, keepdims=True)


def _gln_apply_kernel(y_ref, scale_ref, bias_ref, o_ref):
    # Pure y*scale + bias stream; scale/bias are pre-folded per (batch, channel).
    x = y_ref[...].astype(jnp.float32)                       # (N, tk)
    o_ref[...] = (x * scale_ref[...] + bias_ref[...]).astype(o_ref.dtype)


# --------------------------------- wrapper --------------------------------------

def global_layer_norm(y, gamma, beta, *, force_two_pass=False, max_tk=None):
    """Global Layer Norm.  y: [M, N, K]; gamma/beta: [N, 1] (or torch-style [1, N, 1])."""
    M, N, K = y.shape
    gamma = jnp.reshape(gamma, (N, 1))
    beta = jnp.reshape(beta, (N, 1))

    itemsize = jnp.dtype(y.dtype).itemsize
    sub = 8 * max(1, 4 // itemsize)          # sublane packing: 8 f32, 16 bf16, 32 int8
    Np = _round_up(N, sub)                   # physical VMEM rows (sizing only)
    Kp = _round_up(K, 128)                   # physical VMEM lanes (sizing only)
    inv_count = 1.0 / float(N * K)

    # Generation-aware budgets (v5e/v6e: 128 MiB VMEM, v7x: 64 MiB).
    cap = _vmem_capacity_bytes()
    single_budget = (cap * 72) // 100        # ~92 MiB on v5e/v6e, ~46 MiB on v7x
    tile_budget = cap // 3
    vmem_max = (cap * 84) // 100
    vmem_min = min(32 << 20, vmem_max)

    # Row-chunk for the single-pass in-kernel loops: keep f32 temps around ~2 MiB.
    rchunk = max(sub, min(512, ((2 << 20) // max(1, Kp * 4)) // sub * sub))
    rchunk = min(rchunk, Np)

    slab_phys = Np * Kp * itemsize           # one VMEM copy of the (padded) slab
    est_single = 4 * slab_phys + 4 * rchunk * Kp * 4 + (1 << 20)
    use_two_pass = force_two_pass or est_single > single_budget

    if not use_two_pass:
        # NOTE: with M == 1 only one TensorCore is active here, but this regime is by
        # construction a small slab, so the absolute cost is tiny.
        vmem_limit = _clamp_vmem(est_single, vmem_min, vmem_max)
        return pl.pallas_call(
            functools.partial(_gln_single_kernel,
                              inv_count=inv_count, rchunk=rchunk, sub=sub),
            out_shape=jax.ShapeDtypeStruct((M, N, K), y.dtype),
            grid_spec=pltpu.PrefetchScalarGridSpec(
                num_scalar_prefetch=0,
                grid=(M,),
                in_specs=[
                    pl.BlockSpec((None, N, K), lambda m: (m, 0, 0)),  # full-dim block
                    pl.BlockSpec((N, 1), lambda m: (0, 0)),           # gamma (shared)
                    pl.BlockSpec((N, 1), lambda m: (0, 0)),           # beta  (shared)
                ],
                out_specs=pl.BlockSpec((None, N, K), lambda m: (m, 0, 0)),
            ),
            compiler_params=pltpu.CompilerParams(
                dimension_semantics=("parallel",),
                vmem_limit_bytes=vmem_limit,
            ),
            cost_estimate=pl.CostEstimate(
                flops=7 * M * N * K,
                transcendentals=M,
                bytes_accessed=2 * M * N * K * itemsize,
            ),
        )(y, gamma, beta)

    # ---------------- two-pass (HBM-streaming) fallback for huge slabs ----------------
    # TODO(synk): a manual resident-slab pipeline (pl.ANY + pltpu.emit_pipeline) could
    # cut this 3x HBM traffic back to 2x for mid-size slabs on v7x's 64 MiB VMEM.
    per_lane = 4 * Np * itemsize + 8 * Np + 64
    tk = max(128, (tile_budget // per_lane) // 128 * 128)
    if max_tk is not None:
        tk = min(tk, max(128, (int(max_tk) // 128) * 128))
    tk = min(tk, Kp)
    if tk >= K:
        tk = K                               # full-dim block: no partial tiles at all
    kt = (K + tk - 1) // tk                  # number of K tiles (last may be partial)

    # With M == 1 the only parallelism in pass 1 is the K reduction; split it into two
    # "parallel" halves so both v7x TensorCores stream HBM.
    n_split = 2 if (M == 1 and kt >= 2 and kt % 2 == 0) else 1
    tps = kt // n_split                      # tiles per split

    tk_phys = _round_up(tk, 128)
    est_p1 = (2 * Np * tk_phys * itemsize + 2 * Np * tk_phys * 4
              + 2 * 8 * tk_phys * 4 + (1 << 20))
    est_p2 = 4 * Np * tk_phys * itemsize + 2 * Np * tk_phys * 4 + 2 * Np * 4 + (1 << 20)
    vmem_limit = _clamp_vmem(max(est_p1, est_p2), vmem_min, vmem_max)

    # Pass 1: streaming sum / sum-of-squares per (batch, split).
    s_parts, ss_parts = pl.pallas_call(
        functools.partial(_gln_stats_kernel, seq_len=K),
        out_shape=(
            jax.ShapeDtypeStruct((M, n_split, 1, 1), jnp.float32),
            jax.ShapeDtypeStruct((M, n_split, 1, 1), jnp.float32),
        ),
        grid_spec=pltpu.PrefetchScalarGridSpec(
            num_scalar_prefetch=0,
            grid=(M, n_split, tps),
            in_specs=[
                pl.BlockSpec((None, N, tk), lambda m, s, k: (m, 0, s * tps + k)),
            ],
            out_specs=[
                pl.BlockSpec((None, None, 1, 1), lambda m, s, k: (m, s, 0, 0)),
                pl.BlockSpec((None, None, 1, 1), lambda m, s, k: (m, s, 0, 0)),
            ],
            scratch_shapes=[
                pltpu.VMEM((1, tk), jnp.float32),
                pltpu.VMEM((1, tk), jnp.float32),
            ],
        ),
        compiler_params=pltpu.CompilerParams(
            dimension_semantics=("parallel", "parallel", "arbitrary"),
            vmem_limit_bytes=vmem_limit,
        ),
        cost_estimate=pl.CostEstimate(
            flops=3 * M * N * K,
            transcendentals=0,
            bytes_accessed=M * N * K * itemsize,
        ),
    )(y)

    # Tiny O(M*N) epilogue in plain XLA: combine split partials and fold gamma/beta
    # into per-channel scale/bias, so pass 2 is a pure stream.
    s = jnp.sum(s_parts, axis=1)                              # (M, 1, 1)
    ss = jnp.sum(ss_parts, axis=1)                            # (M, 1, 1)
    mean = s * inv_count
    var = jnp.maximum(ss * inv_count - mean * mean, 0.0)      # guard tiny cancellation
    rstd = jax.lax.rsqrt(var + EPS)
    scale = gamma.astype(jnp.float32)[None, :, :] * rstd      # (M, N, 1)
    bias = beta.astype(jnp.float32)[None, :, :] - mean * scale

    # Pass 2: folded affine over a fully parallel (M, K-tile) grid.
    return pl.pallas_call(
        _gln_apply_kernel,
        out_shape=jax.ShapeDtypeStruct((M, N, K), y.dtype),
        grid_spec=pltpu.PrefetchScalarGridSpec(
            num_scalar_prefetch=0,
            grid=(M, kt),
            in_specs=[
                pl.BlockSpec((None, N, tk), lambda m, k: (m, 0, k)),
                pl.BlockSpec((None, N, 1), lambda m, k: (m, 0, 0)),
                pl.BlockSpec((None, N, 1), lambda m, k: (m, 0, 0)),
            ],
            out_specs=pl.BlockSpec((None, N, tk), lambda m, k: (m, 0, k)),
        ),
        compiler_params=pltpu.CompilerParams(
            dimension_semantics=("parallel", "parallel"),
            vmem_limit_bytes=vmem_limit,
        ),
        cost_estimate=pl.CostEstimate(
            flops=2 * M * N * K,
            transcendentals=0,
            bytes_accessed=2 * M * N * K * itemsize,
        ),
    )(y, scale, bias)


if __name__ == "__main__":
    def ref_gln(y, gamma, beta):
        yf = y.astype(jnp.float32)
        mean = jnp.mean(yf, axis=(1, 2), keepdims=True)
        var = jnp.mean((yf - mean) ** 2, axis=(1, 2), keepdims=True)
        g = jnp.reshape(gamma, (1, -1, 1)).astype(jnp.float32)
        b = jnp.reshape(beta, (1, -1, 1)).astype(jnp.float32)
        return g * (yf - mean) / jnp.sqrt(var + EPS) + b

    key = jax.random.PRNGKey(0)

    # 1) Small shape consistent with the module's forward: [M, N, K] = [2, 4, 16].
    #    reset_parameters(): gamma = 1, beta = 0.
    M, N, K = 2, 4, 16
    y = jax.random.normal(key, (M, N, K), dtype=jnp.float32)
    gamma = jnp.ones((N, 1), dtype=jnp.float32)
    beta = jnp.zeros((N, 1), dtype=jnp.float32)
    ref = ref_gln(y, gamma, beta)
    out = jax.block_until_ready(global_layer_norm(y, gamma, beta))
    assert jnp.allclose(out, ref, atol=1e-5, rtol=1e-5), "single-pass mismatch (small)"
    out = jax.block_until_ready(global_layer_norm(y, gamma, beta, force_two_pass=True))
    assert jnp.allclose(out, ref, atol=1e-5, rtol=1e-5), "two-pass mismatch (small)"

    # 2) Unaligned K, nonzero mean, random affine: exercises the masked last K tile.
    k1, k2, k3 = jax.random.split(jax.random.PRNGKey(1), 3)
    M2, N2, K2 = 2, 24, 1500
    y2 = jax.random.normal(k1, (M2, N2, K2), dtype=jnp.float32) * 1.7 + 0.5
    g2 = jax.random.normal(k2, (N2, 1), dtype=jnp.float32)
    b2 = jax.random.normal(k3, (N2, 1), dtype=jnp.float32)
    ref2 = ref_gln(y2, g2, b2)
    out2 = jax.block_until_ready(global_layer_norm(y2, g2, b2))
    assert jnp.allclose(out2, ref2, atol=1e-4, rtol=1e-4), "single-pass mismatch (mid)"
    out2 = jax.block_until_ready(
        global_layer_norm(y2, g2, b2, force_two_pass=True, max_tk=128))
    assert jnp.allclose(out2, ref2, atol=1e-4, rtol=1e-4), "two-pass mismatch (mid)"

    # 3) M == 1, long unaligned K: exercises the row-chunked single-pass loops and the
    #    two-core split + masked last tile of the two-pass stats kernel.
    M3, N3, K3 = 1, 64, 19904
    y3 = jax.random.normal(jax.random.PRNGKey(2), (M3, N3, K3), dtype=jnp.float32)
    g3 = jnp.ones((N3, 1), dtype=jnp.float32)
    b3 = jnp.zeros((N3, 1), dtype=jnp.float32)
    ref3 = ref_gln(y3, g3, b3)
    out3 = jax.block_until_ready(global_layer_norm(y3, g3, b3))
    assert jnp.allclose(out3, ref3, atol=1e-4, rtol=1e-4), "single-pass mismatch (long)"
    out3 = jax.block_until_ready(
        global_layer_norm(y3, g3, b3, force_two_pass=True, max_tk=128))
    assert jnp.allclose(out3, ref3, atol=1e-4, rtol=1e-4), "two-pass mismatch (long)"

    # 4) bf16 inputs (sublane packing = 16, f32 math inside, single cast on store).
    M4, N4, K4 = 2, 16, 384
    y4 = jax.random.normal(jax.random.PRNGKey(3), (M4, N4, K4), dtype=jnp.bfloat16)
    g4 = jnp.ones((N4, 1), dtype=jnp.bfloat16)
    b4 = jnp.zeros((N4, 1), dtype=jnp.bfloat16)
    ref4 = ref_gln(y4, g4, b4)
    out4 = jax.block_until_ready(global_layer_norm(y4, g4, b4)).astype(jnp.float32)
    assert jnp.allclose(out4, ref4, atol=5e-2, rtol=5e-2), "single-pass mismatch (bf16)"

    print("KERNEL_OK")
</pallas_src>

<mosaic_0001>
module attributes {stable_mosaic.version = 11 : i64} {
  func.func @_gln_single_kernel(%arg0: i32, %arg1: memref<1x4x16xf32, #tpu.memory_space<vmem>>, %arg2: memref<4x1xf32, #tpu.memory_space<vmem>>, %arg3: memref<4x1xf32, #tpu.memory_space<vmem>>, %arg4: memref<1x4x16xf32, #tpu.memory_space<vmem>>) attributes {dimension_semantics = [#tpu.dimension_semantics<parallel>], iteration_bounds = array<i64: 2>, scalar_prefetch = 0 : i64, scratch_operands = 0 : i64, tpu.core_type = #tpu.core_type<tc>, window_params = [{transform_indices = @transform_0, window_bounds = array<i64: 1, 4, 16>}, {pipeline_mode = #tpu.pipeline_mode<synchronous>, transform_indices = @transform_1, window_bounds = array<i64: 4, 1>}, {pipeline_mode = #tpu.pipeline_mode<synchronous>, transform_indices = @transform_2, window_bounds = array<i64: 4, 1>}, {transform_indices = @transform_3, window_bounds = array<i64: 1, 4, 16>}]} {
    %cst = arith.constant 0.000000e+00 : f32
    %0 = vector.broadcast %cst : f32 to vector<1x1xf32>
    %c0 = arith.constant 0 : index
    %c0_0 = arith.constant 0 : index
    %c0_1 = arith.constant 0 : index
    %1 = vector.load %arg1[%c0, %c0_0, %c0_1] : memref<1x4x16xf32, #tpu.memory_space<vmem>>, vector<1x4x16xf32>
    %2 = vector.shape_cast %1 : vector<1x4x16xf32> to vector<4x16xf32>
    %cst_2 = arith.constant dense<0.000000e+00> : vector<16xf32>
    %3 = vector.multi_reduction <add>, %2, %cst_2 [0] : vector<4x16xf32> to vector<16xf32>
    %4 = vector.shape_cast %3 : vector<16xf32> to vector<1x16xf32>
    %cst_3 = arith.constant dense<0.000000e+00> : vector<1xf32>
    %5 = vector.multi_reduction <add>, %4, %cst_3 [1] : vector<1x16xf32> to vector<1xf32>
    %6 = vector.shape_cast %5 : vector<1xf32> to vector<1x1xf32>
    %7 = arith.addf %0, %6 : vector<1x1xf32>
    %cst_4 = arith.constant 1.562500e-02 : f32
    %8 = vector.broadcast %cst_4 : f32 to vector<1x1xf32>
    %9 = arith.mulf %7, %8 : vector<1x1xf32>
    %cst_5 = arith.constant 0.000000e+00 : f32
    %10 = vector.broadcast %cst_5 : f32 to vector<1x1xf32>
    %c0_6 = arith.constant 0 : index
    %c0_7 = arith.constant 0 : index
    %c0_8 = arith.constant 0 : index
    %11 = vector.load %arg1[%c0_6, %c0_7, %c0_8] : memref<1x4x16xf32, #tpu.memory_space<vmem>>, vector<1x4x16xf32>
    %12 = vector.shape_cast %11 : vector<1x4x16xf32> to vector<4x16xf32>
    %13 = vector.broadcast %9 : vector<1x1xf32> to vector<4x16xf32>
    %14 = arith.subf %12, %13 : vector<4x16xf32>
    %15 = arith.mulf %14, %14 : vector<4x16xf32>
    %cst_9 = arith.constant dense<0.000000e+00> : vector<16xf32>
    %16 = vector.multi_reduction <add>, %15, %cst_9 [0] : vector<4x16xf32> to vector<16xf32>
    %17 = vector.shape_cast %16 : vector<16xf32> to vector<1x16xf32>
    %cst_10 = arith.constant dense<0.000000e+00> : vector<1xf32>
    %18 = vector.multi_reduction <add>, %17, %cst_10 [1] : vector<1x16xf32> to vector<1xf32>
    %19 = vector.shape_cast %18 : vector<1xf32> to vector<1x1xf32>
    %20 = arith.addf %10, %19 : vector<1x1xf32>
    %cst_11 = arith.constant 1.562500e-02 : f32
    %21 = vector.broadcast %cst_11 : f32 to vector<1x1xf32>
    %22 = arith.mulf %20, %21 : vector<1x1xf32>
    %cst_12 = arith.constant 9.99999993E-9 : f32
    %23 = vector.broadcast %cst_12 : f32 to vector<1x1xf32>
    %24 = arith.addf %22, %23 : vector<1x1xf32>
    %25 = math.rsqrt %24 : vector<1x1xf32>
    %c0_13 = arith.constant 0 : index
    %c0_14 = arith.constant 0 : index
    %26 = vector.load %arg2[%c0_13, %c0_14] : memref<4x1xf32, #tpu.memory_space<vmem>>, vector<4x1xf32>
    %c0_15 = arith.constant 0 : index
    %c0_16 = arith.constant 0 : index
    %27 = vector.load %arg3[%c0_15, %c0_16] : memref<4x1xf32, #tpu.memory_space<vmem>>, vector<4x1xf32>
    %28 = vector.broadcast %25 : vector<1x1xf32> to vector<4x1xf32>
    %29 = arith.mulf %26, %28 : vector<4x1xf32>
    %30 = vector.broadcast %9 : vector<1x1xf32> to vector<4x1xf32>
    %31 = arith.mulf %30, %29 : vector<4x1xf32>
    %32 = arith.subf %27, %31 : vector<4x1xf32>
    %c0_17 = arith.constant 0 : index
    %c0_18 = arith.constant 0 : index
    %c0_19 = arith.constant 0 : index
    %33 = vector.load %arg1[%c0_17, %c0_18, %c0_19] : memref<1x4x16xf32, #tpu.memory_space<vmem>>, vector<1x4x16xf32>
    %34 = vector.shape_cast %33 : vector<1x4x16xf32> to vector<4x16xf32>
    %35 = vector.broadcast %29 : vector<4x1xf32> to vector<4x16xf32>
    %36 = arith.mulf %34, %35 : vector<4x16xf32>
    %37 = vector.broadcast %32 : vector<4x1xf32> to vector<4x16xf32>
    %38 = arith.addf %36, %37 : vector<4x16xf32>
    %c0_20 = arith.constant 0 : index
    %c0_21 = arith.constant 0 : index
    %c0_22 = arith.constant 0 : index
    %39 = vector.load %arg4[%c0_20, %c0_21, %c0_22] : memref<1x4x16xf32, #tpu.memory_space<vmem>>, vector<1x4x16xf32>
    %40 = vector.shape_cast %39 : vector<1x4x16xf32> to vector<4x16xf32>
    %41 = vector.shape_cast %38 : vector<4x16xf32> to vector<1x4x16xf32>
    tpu.vector_store %arg4[%c0_20, %c0_21, %c0_22], %41 {strides = array<i32>} : memref<1x4x16xf32, #tpu.memory_space<vmem>>, vector<1x4x16xf32>,
    return
  }
  func.func @transform_0(%arg0: i32) -> (i32, i32, i32) {
    %c0_i32 = arith.constant 0 : i32
    %c0_i32_0 = arith.constant 0 : i32
    %c0_i32_1 = arith.constant 0 : i32
    return %arg0, %c0_i32, %c0_i32_0 : i32, i32, i32
  }
  func.func @transform_1(%arg0: i32) -> (i32, i32) {
    %c0_i32 = arith.constant 0 : i32
    %c0_i32_0 = arith.constant 0 : i32
    %c0_i32_1 = arith.constant 0 : i32
    return %c0_i32, %c0_i32_0 : i32, i32
  }
  func.func @transform_2(%arg0: i32) -> (i32, i32) {
    %c0_i32 = arith.constant 0 : i32
    %c0_i32_0 = arith.constant 0 : i32
    %c0_i32_1 = arith.constant 0 : i32
    return %c0_i32, %c0_i32_0 : i32, i32
  }
  func.func @transform_3(%arg0: i32) -> (i32, i32, i32) {
    %c0_i32 = arith.constant 0 : i32
    %c0_i32_0 = arith.constant 0 : i32
    %c0_i32_1 = arith.constant 0 : i32
    return %arg0, %c0_i32, %c0_i32_0 : i32, i32, i32
  }
}

</mosaic_0001>

<bundles_post_ra>
// kernel: tpu_custom_call.1
= control target key start
LH: loop header
LB: loop body
LE: loop exit
PB: predicated region body
PF: predicated region fallthrough
CT: control target
= control target key end

     0   :  { %8 = vsyncpa [#allocation3], 0  ;;  %s537_s0 = inlined_call_operand.vmem [shape: f32[2,4,16], index: 0, kind: input, shape index: {}]   ;;  %s538_s1 = inlined_call_operand.vmem [shape: f32[4,1], index: 1, kind: input, shape index: {}]   ;;  %s539_s2 = inlined_call_operand.vmem [shape: f32[4,1], index: 2, kind: input, shape index: {}]   ;;  %s540_s3 = inlined_call_operand.hbm [shape: f32[2,4,16], index: 3, kind: output, shape index: {}]  }
   0x1   :  { %10 = vsyncpa [#allocation3 + $0x1], 0  ;;  %s428_s12 = smov 0   ;;  %s430_s13 = smov 0  }
   0x2   :  { %s432_s14 = smov 0   ;;  %s434_s15 = smov 0  }
   0x3 LB: > { %s449_s16 = sadd.s32 4294967295, %s404_s15   ;;  %s288_s17 = sadd.s32 4294967294, %s404_s15   ;;  %s404_s15 = sphi %s434_s15, %s546_s15   ;;  %s400_s14 = sphi %s432_s14, %s545_s14   ;;  %s396_s13 = sphi %s430_s13, %s544_s13   ;;  %s392_s12 = sphi %s428_s12, %s543_s12  }
   0x4   : > { %s453_s18 = sadd.s32 1, %s404_s15   ;;  %s91_s19 = sadd.s32 1, %s400_s14 }
   0x5   : > { %s88_s20 = ssub.s32 %s404_s15, %s453_s18  ;;  %p101_p0 = scmp.ne.s32.totalorder %s400_s14, %s396_s13 }
   0x6   : > { %p89_p1 = scmp.eq.s32.totalorder %s88_s20, 0  ;;  %p102_p2 = scmp.eq.s32.totalorder %s449_s16, 1 }
   0x7   : > { %p107_p3 = scmp.ne.s32.totalorder %s396_s13, %s392_s12  ;;  %p108_p4 = scmp.eq.s32.totalorder %s288_s17, 1 }
   0x8   : > { %s464_s21 = scalar_select %p89_p1, %s400_s14, %s91_s19  }
   0x9   : > { %p466_p5 = por %p102_p2, %p101_p0  ;;  %p470_p6 = por %p108_p4, %p107_p3 }
   0xa   : > { %p291_p7 = scmp.ge.s32.totalorder %s404_s15, 1  ;;  %p139_p8 = scmp.lt.s32.totalorder %s404_s15, 3 }
   0xc   : > { %p140_p9 = pnand %p291_p7, %p139_p8 }
   0xd   : > { %p162_p10 = scmp.lt.s32.totalorder (!%p140_p9), %s449_s16, 1  ;;  %vm167_vm0 = vcmask (!%p140_p9), 125952   ;;  %vm175_vm1 = vcmask (!%p140_p9), 130048   ;;  %v406_v21 = vmov (!%p140_p9), 0   ;;  %v197_v25 = vld [vmem:[%s538_s1] sm:$0xf] (!%p140_p9) }
   0xe   : > { %143 = sbr.rel (%p140_p9) target bundleno = 509 (0x1fd), region = 32  ;;  %338 = vset.pattern.permute.xlu1 (!%p140_p9), %v406_v21  ;;  %339 = vset.pattern.permute.xlu0 (!%p140_p9), %v406_v21  ;;  %v198_v28 = vld [vmem:[%s539_s2] sm:$0xf] (!%p140_p9)  ;;  %s159_s6 = sand.u32 (!%p140_p9), 1, %s396_s13  }
   0xf   : > { %s292_s7 = sshll.u32 (!%p140_p9), %s159_s6, 2  ;;  %s295_s8 = sshll.u32 (!%p140_p9), %s449_s16, 6 }
  0x10   : > { %s161_s9 = scalar_lea.vmem (!%p140_p9), [#allocation2], %s292_s7  ;;  %s494_s19 = scalar_lea.hbm (!%p140_p9), %s540_s3, %s295_s8 }
  0x11   : > { %s229_s10 = sshll.u32 (!%p140_p9), %s161_s9, 4  ;;  %s216_s20 = scalar_lea.sflag (!%p140_p9), [#allocation3], %s159_s6  ;;  %s496_s10 = int_to_ptr.vmem [resolvable:$true] %s229_s10 }
  0x15   : > { %s163_s24 = scalar_select %p162_p10, %s449_s16, 1 }
  0x16   : > { %s407_s16 = smov [#allocation2]  }
  0x17   : > { %s293_s25 = sshll.u32 %s163_s24, 2  ;;  %s342_s24 = scalar_lea.vmem %s496_s10, 64 }
  0x18   : > { %s165_s28 = scalar_lea.vmem %s537_s0, %s293_s25  ;;  %p343_p11 = scmp.ne.s32.totalorder %s496_s10, %s342_s24 }
  0x19   : > { %v166_v0 = vld [vmem:[%s165_s28] sm:$0xf]  ;;  %s346_s25 = sshll.u32 %s407_s16, 4  ;;  %s347_s25 = int_to_ptr.vmem [resolvable:$false] %s346_s25 }
  0x1a   : > { %v168_v1 = vsel %vm167_vm0, %v166_v0, 0.0  ;;  %p344_p12 = pnand %p343_p11, %p466_p5  ;;  %s348_s26 = scalar_lea.vmem %s347_s25, 128 }
  0x1b   : > { %v169_v2 = vrot.slane %v168_v1, 4  ;;  %p349_p0 = scmp.lt.s32.totalorder %s496_s10, %s347_s25  ;;  %p350_p1 = scmp.lt.s32.totalorder %s348_s26, %s342_s24 }
  0x1c   : > { %p345_p13 = pneg %p344_p12 }
  0x1d   : > { %v170_v3 = vadd.f32 %v169_v2, %v168_v1  ;;  %p351_p2 = por %p350_p1, %p349_p0 }
  0x1f   : > { %v171_v4 = vrot.slane %v170_v3, 2  ;;  %p352_p3 = pnand %p351_p2, %p345_p13 }
  0x21   : > { %v172_v5 = vadd.f32 %v171_v4, %v170_v3 }
  0x23   : > { %v173_v6 = vrot.slane %v172_v5, 1 }
  0x25   : > { %v174_v7 = vadd.f32 %v173_v6, %v172_v5 }
  0x27   : > { %v176_v8 = vsel %vm175_vm1, %v174_v7, 0.0 }
  0x28   : > { %177 = vadd.xlane.f32.xlu0 %v176_v8 }
  0xb5   : > { %v178_v9 = vpop.xlane.xlu0 %177 }
  0xb6   : > { %v180_v10 = vmul.f32 0.015625, %v178_v9 }
  0xb8   : > { %v181_v11 = vsub.f32 %v166_v0, %v180_v10 }
  0xba   : > { %v182_v12 = vmul.f32 %v181_v11, %v181_v11 }
  0xbc   : > { %v183_v13 = vsel %vm167_vm0, %v182_v12, 0.0 }
  0xbd   : > { %v184_v14 = vrot.slane %v183_v13, 4 }
  0xbf   : > { %v185_v15 = vadd.f32 %v184_v14, %v183_v13 }
  0xc1   : > { %v186_v16 = vrot.slane %v185_v15, 2 }
  0xc3   : > { %v187_v17 = vadd.f32 %v186_v16, %v185_v15 }
  0xc5   : > { %v188_v18 = vrot.slane %v187_v17, 1 }
  0xc7   : > { %v189_v19 = vadd.f32 %v188_v18, %v187_v17 }
  0xc9   : > { %v190_v20 = vsel %vm175_vm1, %v189_v19, 0.0 }
  0xca   : > { %191 = vadd.xlane.f32.xlu0 %v190_v20 }
 0x157   : > { %v192_v22 = vpop.xlane.xlu0 %191 }
 0x158   : > { %v194_v23 = vmul.f32 0.015625, %v192_v22 }
 0x15a   : > { %v195_v24 = vadd.f32 1e-08, %v194_v23 }
 0x15c   : > { %340 = vrsqrt.f32 %v195_v24 }
 0x166   : > { %v341_v26 = vpop.eup %340 }
 0x167   : > { %v199_v27 = vmul.f32 %v341_v26, %v197_v25 }
 0x169   : > { %204 = vperm.xlu1 %338, %v199_v27   ;;  %v200_v29 = vmul.f32 %v199_v27, %v180_v10 }
 0x16b   : > { %v201_v30 = vsub.f32 %v198_v28, %v200_v29 }
 0x16d   : > { %210 = vperm.xlu1 %338, %v201_v30  }
 0x1e8   : > { %v205_v31 = vpop.permute.xlu1 %204 }
 0x1e9   : > { %v207_v32 = vmul.f32 %v205_v31, %v166_v0 }
 0x1ec   : > { %v211_v33 = vpop.permute.xlu1 %210 }
 0x1ed   : > { %v213_v34 = vadd.f32 %v211_v33, %v207_v32 }
 0x1ef   : > { %214 = vst.msk [vmem:[%s161_s9] sm:$0xf] %vm167_vm0, %v213_v34 }
 0x1f0   : > { %355 = shalt.err (!%p352_p3)
}
 0x1f1   : > { %s356_s27 = scalar_lea.hbm %s494_s19, 64  ;;  %s360_s30 = scalar_lea.hbm %s540_s3, 128 }
 0x1f2   : > { %p357_p4 = scmp.ne.s32.totalorder %s494_s19, %s356_s27  ;;  %p361_p9 = scmp.lt.u32.totalorder %s494_s19, %s540_s3 }
 0x1f3   : > { %p362_p10 = scmp.lt.u32.totalorder %s360_s30, %s356_s27  ;;  %p364_p12 = scmp.lt.u32.totalorder %s356_s27, %s494_s19 }
 0x1f4   : > { %p358_p7 = pnand %p357_p4, %p466_p5 }
 0x1f5   : > { %p363_p11 = por %p362_p10, %p361_p9 }
 0x1f6   : > { %p359_p8 = pneg %p358_p7 }
 0x1f7   : > { %p365_p13 = por %p364_p12, %p363_p11 }
 0x1f9   : > { %p366_p0 = pnand %p365_p13, %p359_p8 }
 0x1fb   : > { %369 = shalt.err (!%p366_p0)
}
 0x1fc   : > { %298 = dma.vmem_to_hbm [thread:$0]  (%p466_p5), %s496_s10, 64, %s494_s19, %s216_s20  }
 0x1fd PF: > { %p304_p1 = scmp.ge.s32.totalorder %s404_s15, 2  ;;  %s241_s6 = sand.u32 1, %s392_s12  }
 0x1fe   : > { %s242_s7 = scalar_lea.sflag [#allocation3], %s241_s6 }
 0x1ff   : > { %p301_p2 = pnand %p304_p1, %p470_p6 }
 0x201   : > { %387 = dma.done.wait (!%p301_p2), %s242_s7, 64  }
 0x202   : > { %389 = vsyncadd (!%p301_p2), %s242_s7, 4294967232  ;;  %p13_p3 = scmp.ge.s32.totalorder %s453_s18, 4   ;;  %s543_s12 = smov %s396_s13 }
 0x203   : > { %s544_s13 = smov %s400_s14  ;;  %s545_s14 = smov %s464_s21 }
 0x204   : > { %s546_s15 = smov %s453_s18  ;;  %15 = sbr.rel (!%p13_p3) target bundleno = 3 (0x3), region = 67 }
 0x20b   :  { %247 = vsyncpa [#allocation3], 1 }
 0x20c   :  { %249 = vsyncpa [#allocation3 + $0x1], 1 }

</bundles_post_ra>
